<compile_context>
chip_gen: v7x
topology: tpu7x:2x2x1
jax: 0.10.0
libtpu: 0.0.40
codegen_flags: <defaults>
</compile_context>

<pallas_src>
import functools

import jax
import jax.numpy as jnp
from jax import lax
from jax.experimental import pallas as pl
from jax.experimental.pallas import tpu as pltpu

LANE = 128          # TPU vreg lane width
SUBLANE_BF16 = 16   # bf16 sublane pack


def _round_up(n, m):
    return ((n + m - 1) // m) * m


def _pad_last(a, to):
    pad = to - a.shape[-1]
    if pad == 0:
        return a
    return jnp.pad(a, [(0, 0)] * (a.ndim - 1) + [(0, pad)])


def _youtube_dnn_kernel(x_ref, w1_ref, b1_ref, w2_ref, b2_ref, items_ref, y_ref,
                        *, n_items, d_pad, n_pad, inv_temperature):
    # ---- user tower MLP (bf16 MXU inputs, f32 accumulation) ----
    # Linear -> BatchNorm1d (identity at eval/default init) -> ReLU, per torch_rechub MLP
    # (activation on every `dims` layer since output_layer=False; dropout = eval identity).
    h = jnp.dot(x_ref[...], w1_ref[...], preferred_element_type=jnp.float32) + b1_ref[...]
    h = jnp.maximum(h, 0.0)
    u = jnp.dot(h.astype(w2_ref.dtype), w2_ref[...],
                preferred_element_type=jnp.float32) + b2_ref[...]
    u = jnp.maximum(u, 0.0)                                   # [tb, Dp] f32 (pad cols are 0)

    # F.normalize(p=2, dim=-1, eps=1e-12): 1/max(||x||,1e-12) == rsqrt(max(sum(x*x),1e-24)).
    inv_u = lax.rsqrt(jnp.maximum(jnp.sum(u * u, axis=-1, keepdims=True), 1e-24))  # [tb, 1]

    tb = y_ref.shape[0]
    lane = lax.broadcasted_iota(jnp.int32, (tb, n_pad), 1)
    y = jnp.zeros((tb, n_pad), jnp.float32)
    # Static loop over the n_items lane-slices of the flattened [tb, n_items*Dp] items
    # block: every slice is a lane-dense [tb, Dp]; no 3-D broadcast temporary is built.
    for n in range(n_items):
        it = items_ref[:, n * d_pad:(n + 1) * d_pad].astype(jnp.float32)   # [tb, Dp]
        raw = jnp.sum(u * it, axis=-1, keepdims=True)                      # [tb, 1]
        inv_it = lax.rsqrt(jnp.maximum(jnp.sum(it * it, axis=-1, keepdims=True), 1e-24))
        y = jnp.where(lane == n, raw * inv_it, y)
    # Fused normalization + temperature; lane-dense [tb, n_pad] store (n_pad % 128 == 0).
    y_ref[...] = y * (inv_u * inv_temperature)


def _pick_tb(B, *, min_steps=4, tb_max=1024):
    """Batch tile: a multiple of 16 (bf16 sublane pack) dividing B.  Prefer >= min_steps
    grid steps (>=2 per TensorCore on v7x megacore, and DMA/compute overlap per core), but
    otherwise stay as large as possible (<= tb_max) to amortize the ~0.35us per-grid-step
    overhead on v5e/v6e."""
    if B <= SUBLANE_BF16:
        return B
    cands = [t for t in range(SUBLANE_BF16, min(B, tb_max) + 1, SUBLANE_BF16) if B % t == 0]
    if not cands:
        # TODO(synk): pad the batch to a multiple of 16 instead of one full-batch step.
        return B
    pipelined = [t for t in cands if B // t >= min_steps]
    return max(pipelined) if pipelined else min(cands)


def _vmem_limit_bytes(tb, d_in, h1p, d_pad, n_items, n_pad):
    """Derive the VMEM request from the actual buffers (stays well under v7x's 64 MiB)."""
    bf16 = 2
    x_tile = tb * d_in * bf16
    items_tile = tb * n_items * d_pad * bf16
    y_tile = tb * n_pad * 4
    weights = (d_in * h1p + h1p * d_pad) * bf16 + (h1p + d_pad) * 4
    # x / items / y tiles are double-buffered by the pipeline; weights/biases are resident
    # but also double-buffered by default.  (pl.Buffered(1) on the weight specs would halve
    # that; skipped here — only matters for production-sized H1/Dp under 64 MiB VMEM.)
    total = 2 * (x_tile + items_tile + y_tile) + 2 * weights
    total += 8 << 20        # slack for f32 intermediates / compiler scratch
    return max(total, 16 << 20)


def youtube_dnn_scores(x, items_flat, w1, b1, w2, b2, *, n_items, temperature=1.0, tb=None):
    """Fused user-MLP + L2-normalize + similarity score kernel.

    Expects layout-prepared operands (see make_youtube_dnn):
      x          [B, D_in]        bf16
      items_flat [B, n_items*Dp]  bf16   (Dp a multiple of 128, zero-padded embedding dim)
      w1 [D_in, H1p] / w2 [H1p, Dp] bf16, b1 [1, H1p] / b2 [1, Dp] f32
    Returns lane-padded scores [B, n_pad] f32; valid columns are [:, :n_items].
    """
    B, d_in = x.shape
    nd = items_flat.shape[1]
    assert nd % n_items == 0
    d_pad = nd // n_items
    h1p = w1.shape[1]
    assert d_pad % LANE == 0 and h1p % LANE == 0
    assert w2.shape == (h1p, d_pad) and b1.shape == (1, h1p) and b2.shape == (1, d_pad)
    n_pad = _round_up(max(n_items, LANE), LANE)

    if tb is None:
        tb = _pick_tb(B)
    assert B % tb == 0
    assert tb == B or tb % SUBLANE_BF16 == 0

    kernel = functools.partial(_youtube_dnn_kernel, n_items=n_items, d_pad=d_pad,
                               n_pad=n_pad, inv_temperature=1.0 / float(temperature))

    return pl.pallas_call(
        kernel,
        out_shape=jax.ShapeDtypeStruct((B, n_pad), jnp.float32),
        grid_spec=pltpu.PrefetchScalarGridSpec(
            num_scalar_prefetch=0,
            grid=(B // tb,),
            in_specs=[
                pl.BlockSpec((tb, d_in), lambda i: (i, 0)),        # user input tile
                pl.BlockSpec((d_in, h1p), lambda i: (0, 0)),       # W1 (resident)
                pl.BlockSpec((1, h1p), lambda i: (0, 0)),          # b1
                pl.BlockSpec((h1p, d_pad), lambda i: (0, 0)),      # W2 (resident)
                pl.BlockSpec((1, d_pad), lambda i: (0, 0)),        # b2
                pl.BlockSpec((tb, nd), lambda i: (i, 0)),          # flattened item embeddings
            ],
            out_specs=pl.BlockSpec((tb, n_pad), lambda i: (i, 0)),
        ),
        compiler_params=pltpu.CompilerParams(
            dimension_semantics=("parallel",),
            vmem_limit_bytes=_vmem_limit_bytes(tb, d_in, h1p, d_pad, n_items, n_pad)),
    )(x, w1, b1, w2, b2, items_flat)


def make_youtube_dnn(user_tables, item_table, w1, b1, w2, b2, *, n_neg,
                     temperature=1.0, compute_dtype=jnp.bfloat16):
    """One-time parameter prep (bf16 cast + zero-pad embedding/hidden dims to the lane
    width) and a jitted forward over sparse ids.  Mirrors YoutubeDNN.forward (mode=None)."""
    h1 = w1.shape[1]
    d = w2.shape[1]
    assert item_table.shape[1] == d, "item embedding dim must equal last MLP dim"
    h1p = _round_up(h1, LANE)
    d_pad = _round_up(d, LANE)
    n_items = 1 + n_neg

    # Persistent low-precision / padded parameters (cast & pad ONCE, not per forward call).
    # Zero-padded columns/rows change neither the dot products nor the L2 norms.
    user_tables_lp = tuple(t.astype(compute_dtype) for t in user_tables)
    item_table_lp = _pad_last(item_table, d_pad).astype(compute_dtype)       # [V_item, Dp]
    w1_lp = _pad_last(w1, h1p).astype(compute_dtype)                         # [D_in, H1p]
    b1_f = _pad_last(b1.reshape(1, -1), h1p).astype(jnp.float32)             # [1, H1p]
    w2_lp = _pad_last(jnp.pad(w2, ((0, h1p - h1), (0, 0))), d_pad).astype(compute_dtype)
    b2_f = _pad_last(b2.reshape(1, -1), d_pad).astype(jnp.float32)           # [1, Dp]

    @jax.jit
    def forward(user_ids, pos_item_id, neg_item_ids):
        B = pos_item_id.shape[0]
        # Embedding gathers stay in plain JAX (glue); they already emit bf16 tensors in the
        # padded, flattened layout the kernel wants, so there are no extra cast/relayout
        # HBM passes per call.
        # TODO(synk): fuse the item gather into the kernel via scalar-prefetched ids +
        # manual DMA from item_table_lp to drop the items HBM round-trip entirely.
        x = jnp.concatenate([t[ids] for t, ids in zip(user_tables_lp, user_ids)], axis=-1)
        pos = item_table_lp[pos_item_id]                                     # [B, Dp]
        neg = item_table_lp[neg_item_ids].reshape(B, n_neg * d_pad)          # [B, n_neg*Dp]
        items_flat = jnp.concatenate([pos, neg], axis=-1)                    # [B, n_items*Dp]
        y_pad = youtube_dnn_scores(x, items_flat, w1_lp, b1_f, w2_lp, b2_f,
                                   n_items=n_items, temperature=temperature)
        return y_pad[:, :n_items]                                            # [B, 1 + n_neg]

    return forward


def _reference_forward(user_input, items, w1, b1, w2, b2, temperature=1.0):
    h = jnp.maximum(user_input @ w1 + b1.reshape(1, -1), 0.0)
    u = jnp.maximum(h @ w2 + b2.reshape(1, -1), 0.0)
    u = u / jnp.maximum(jnp.linalg.norm(u, axis=-1, keepdims=True), 1e-12)
    it = items / jnp.maximum(jnp.linalg.norm(items, axis=-1, keepdims=True), 1e-12)
    return jnp.sum(u[:, None, :] * it, axis=-1) / temperature


if __name__ == "__main__":
    key = jax.random.PRNGKey(0)

    # ---- small, forward-consistent shapes ----
    B = 256                    # batch (tiled into 4 grid steps of 64 rows)
    n_user_feats = 3           # e.g. user_id, gender, age
    user_embed_dim = 16
    user_dims = n_user_feats * user_embed_dim         # 48
    mlp_dims = [64, 32]                                # user_params["dims"]
    item_embed_dim = mlp_dims[-1]                      # 32, must match user tower output
    n_neg = 4                                          # negative items per sample
    temperature = 1.0
    vocab_user, vocab_item = 100, 200

    ks = jax.random.split(key, 12)

    # ---- deterministic parameter init (embedding tables + MLP weights) ----
    user_tables = [0.1 * jax.random.normal(ks[i], (vocab_user, user_embed_dim), jnp.float32)
                   for i in range(n_user_feats)]
    item_table = 0.1 * jax.random.normal(ks[3], (vocab_item, item_embed_dim), jnp.float32)

    w1 = jax.random.normal(ks[4], (user_dims, mlp_dims[0]), jnp.float32) * (user_dims ** -0.5)
    b1 = jnp.zeros((1, mlp_dims[0]), jnp.float32)
    w2 = jax.random.normal(ks[5], (mlp_dims[0], mlp_dims[1]), jnp.float32) * (mlp_dims[0] ** -0.5)
    b2 = jnp.zeros((1, mlp_dims[1]), jnp.float32)
    # TODO(synk): BatchNorm1d running-stat updates / dropout RNG (training mode) have no
    # clean Pallas forward equivalent here; at eval/default init they are identities.

    # ---- example inputs (sparse ids) ----
    user_ids = [jax.random.randint(ks[6 + i], (B,), 0, vocab_user) for i in range(n_user_feats)]
    pos_item_id = jax.random.randint(ks[9], (B,), 0, vocab_item)
    neg_item_ids = jax.random.randint(ks[10], (B, n_neg), 0, vocab_item)

    # ---- build and run the fused forward ----
    forward = make_youtube_dnn(user_tables, item_table, w1, b1, w2, b2,
                               n_neg=n_neg, temperature=temperature)
    y = forward(user_ids, pos_item_id, neg_item_ids)
    y = jax.block_until_ready(y)

    # ---- pure-JAX reference on the same bf16-rounded operands the kernel consumes ----
    # (the kernel additionally rounds the hidden activation to bf16, hence the tolerance)
    def _rt(a):
        return a.astype(jnp.bfloat16).astype(jnp.float32)

    user_input_f32 = jnp.concatenate([t[ids] for t, ids in zip(user_tables, user_ids)], axis=-1)
    items_f32 = jnp.concatenate([item_table[pos_item_id][:, None, :],
                                 item_table[neg_item_ids]], axis=1)          # [B, 1+n_neg, D]
    y_ref = _reference_forward(_rt(user_input_f32), _rt(items_f32), _rt(w1), b1, _rt(w2), b2,
                               temperature)

    assert y.shape == (B, 1 + n_neg)
    assert jnp.allclose(y, y_ref, atol=2e-2, rtol=2e-2), "mismatch vs reference"

    print("KERNEL_OK")
</pallas_src>

<mosaic_0001>
module attributes {stable_mosaic.version = 11 : i64} {
  func.func @_youtube_dnn_kernel(%arg0: i32, %arg1: memref<64x48xbf16, #tpu.memory_space<vmem>>, %arg2: memref<48x128xbf16, #tpu.memory_space<vmem>>, %arg3: memref<1x128xf32, #tpu.memory_space<vmem>>, %arg4: memref<128x128xbf16, #tpu.memory_space<vmem>>, %arg5: memref<1x128xf32, #tpu.memory_space<vmem>>, %arg6: memref<64x640xbf16, #tpu.memory_space<vmem>>, %arg7: memref<64x128xf32, #tpu.memory_space<vmem>>) attributes {dimension_semantics = [#tpu.dimension_semantics<parallel>], iteration_bounds = array<i64: 4>, scalar_prefetch = 0 : i64, scratch_operands = 0 : i64, tpu.core_type = #tpu.core_type<tc>, window_params = [{transform_indices = @transform_0, window_bounds = array<i64: 64, 48>}, {pipeline_mode = #tpu.pipeline_mode<synchronous>, transform_indices = @transform_1, window_bounds = array<i64: 48, 128>}, {pipeline_mode = #tpu.pipeline_mode<synchronous>, transform_indices = @transform_2, window_bounds = array<i64: 1, 128>}, {pipeline_mode = #tpu.pipeline_mode<synchronous>, transform_indices = @transform_3, window_bounds = array<i64: 128, 128>}, {pipeline_mode = #tpu.pipeline_mode<synchronous>, transform_indices = @transform_4, window_bounds = array<i64: 1, 128>}, {transform_indices = @transform_5, window_bounds = array<i64: 64, 640>}, {transform_indices = @transform_6, window_bounds = array<i64: 64, 128>}]} {
    %c0 = arith.constant 0 : index
    %c0_0 = arith.constant 0 : index
    %0 = vector.load %arg1[%c0, %c0_0] : memref<64x48xbf16, #tpu.memory_space<vmem>>, vector<64x48xbf16>
    %c0_1 = arith.constant 0 : index
    %c0_2 = arith.constant 0 : index
    %1 = vector.load %arg2[%c0_1, %c0_2] : memref<48x128xbf16, #tpu.memory_space<vmem>>, vector<48x128xbf16>
    %cst = arith.constant dense<0.000000e+00> : vector<64x128xf32>
    %2 = tpu.matmul %0, %1, %cst {dimension_numbers = #tpu.dot_dimension_numbers<[1], [0], [0], [1], [0, 0, 1, 1], [], []>} : vector<64x48xbf16>, vector<48x128xbf16>, vector<64x128xf32> -> vector<64x128xf32>
    %c0_3 = arith.constant 0 : index
    %c0_4 = arith.constant 0 : index
    %3 = vector.load %arg3[%c0_3, %c0_4] : memref<1x128xf32, #tpu.memory_space<vmem>>, vector<1x128xf32>
    %4 = vector.broadcast %3 : vector<1x128xf32> to vector<64x128xf32>
    %5 = arith.addf %2, %4 : vector<64x128xf32>
    %cst_5 = arith.constant 0.000000e+00 : f32
    %6 = vector.broadcast %cst_5 : f32 to vector<64x128xf32>
    %7 = arith.maximumf %5, %6 : vector<64x128xf32>
    %8 = arith.truncf %7 : vector<64x128xf32> to vector<64x128xbf16>
    %c0_6 = arith.constant 0 : index
    %c0_7 = arith.constant 0 : index
    %9 = vector.load %arg4[%c0_6, %c0_7] : memref<128x128xbf16, #tpu.memory_space<vmem>>, vector<128x128xbf16>
    %cst_8 = arith.constant dense<0.000000e+00> : vector<64x128xf32>
    %10 = tpu.matmul %8, %9, %cst_8 {dimension_numbers = #tpu.dot_dimension_numbers<[1], [0], [0], [1], [0, 0, 1, 1], [], []>} : vector<64x128xbf16>, vector<128x128xbf16>, vector<64x128xf32> -> vector<64x128xf32>
    %c0_9 = arith.constant 0 : index
    %c0_10 = arith.constant 0 : index
    %11 = vector.load %arg5[%c0_9, %c0_10] : memref<1x128xf32, #tpu.memory_space<vmem>>, vector<1x128xf32>
    %12 = vector.broadcast %11 : vector<1x128xf32> to vector<64x128xf32>
    %13 = arith.addf %10, %12 : vector<64x128xf32>
    %cst_11 = arith.constant 0.000000e+00 : f32
    %14 = vector.broadcast %cst_11 : f32 to vector<64x128xf32>
    %15 = arith.maximumf %13, %14 : vector<64x128xf32>
    %16 = arith.mulf %15, %15 : vector<64x128xf32>
    %cst_12 = arith.constant dense<0.000000e+00> : vector<64xf32>
    %17 = vector.multi_reduction <add>, %16, %cst_12 [1] : vector<64x128xf32> to vector<64xf32>
    %18 = vector.shape_cast %17 : vector<64xf32> to vector<64x1xf32>
    %cst_13 = arith.constant 1.000000e-24 : f32
    %19 = vector.broadcast %cst_13 : f32 to vector<64x1xf32>
    %20 = arith.maximumf %18, %19 : vector<64x1xf32>
    %21 = math.rsqrt %20 : vector<64x1xf32>
    %22 = tpu.iota {dimensions = array<i32: 1>} : vector<64x128xi32>
    %cst_14 = arith.constant 0.000000e+00 : f32
    %23 = vector.broadcast %cst_14 : f32 to vector<64x128xf32>
    %c0_15 = arith.constant 0 : index
    %c0_16 = arith.constant 0 : index
    %24 = vector.load %arg6[%c0_15, %c0_16] : memref<64x640xbf16, #tpu.memory_space<vmem>>, vector<64x128xbf16>
    %25 = arith.extf %24 : vector<64x128xbf16> to vector<64x128xf32>
    %26 = arith.mulf %15, %25 : vector<64x128xf32>
    %cst_17 = arith.constant dense<0.000000e+00> : vector<64xf32>
    %27 = vector.multi_reduction <add>, %26, %cst_17 [1] : vector<64x128xf32> to vector<64xf32>
    %28 = vector.shape_cast %27 : vector<64xf32> to vector<64x1xf32>
    %29 = arith.mulf %25, %25 : vector<64x128xf32>
    %cst_18 = arith.constant dense<0.000000e+00> : vector<64xf32>
    %30 = vector.multi_reduction <add>, %29, %cst_18 [1] : vector<64x128xf32> to vector<64xf32>
    %31 = vector.shape_cast %30 : vector<64xf32> to vector<64x1xf32>
    %cst_19 = arith.constant 1.000000e-24 : f32
    %32 = vector.broadcast %cst_19 : f32 to vector<64x1xf32>
    %33 = arith.maximumf %31, %32 : vector<64x1xf32>
    %34 = math.rsqrt %33 : vector<64x1xf32>
    %c0_i32 = arith.constant 0 : i32
    %35 = vector.broadcast %c0_i32 : i32 to vector<64x128xi32>
    %36 = arith.cmpi eq, %22, %35 : vector<64x128xi32>
    %37 = arith.mulf %28, %34 : vector<64x1xf32>
    %38 = vector.shape_cast %37 : vector<64x1xf32> to vector<64x1xf32>
    %39 = vector.broadcast %38 : vector<64x1xf32> to vector<64x128xf32>
    %40 = arith.select %36, %39, %23 : vector<64x128xi1>, vector<64x128xf32>
    %c0_20 = arith.constant 0 : index
    %c128 = arith.constant 128 : index
    %41 = vector.load %arg6[%c0_20, %c128] : memref<64x640xbf16, #tpu.memory_space<vmem>>, vector<64x128xbf16>
    %42 = arith.extf %41 : vector<64x128xbf16> to vector<64x128xf32>
    %43 = arith.mulf %15, %42 : vector<64x128xf32>
    %cst_21 = arith.constant dense<0.000000e+00> : vector<64xf32>
    %44 = vector.multi_reduction <add>, %43, %cst_21 [1] : vector<64x128xf32> to vector<64xf32>
    %45 = vector.shape_cast %44 : vector<64xf32> to vector<64x1xf32>
    %46 = arith.mulf %42, %42 : vector<64x128xf32>
    %cst_22 = arith.constant dense<0.000000e+00> : vector<64xf32>
    %47 = vector.multi_reduction <add>, %46, %cst_22 [1] : vector<64x128xf32> to vector<64xf32>
    %48 = vector.shape_cast %47 : vector<64xf32> to vector<64x1xf32>
    %cst_23 = arith.constant 1.000000e-24 : f32
    %49 = vector.broadcast %cst_23 : f32 to vector<64x1xf32>
    %50 = arith.maximumf %48, %49 : vector<64x1xf32>
    %51 = math.rsqrt %50 : vector<64x1xf32>
    %c1_i32 = arith.constant 1 : i32
    %52 = vector.broadcast %c1_i32 : i32 to vector<64x128xi32>
    %53 = arith.cmpi eq, %22, %52 : vector<64x128xi32>
    %54 = arith.mulf %45, %51 : vector<64x1xf32>
    %55 = vector.shape_cast %54 : vector<64x1xf32> to vector<64x1xf32>
    %56 = vector.broadcast %55 : vector<64x1xf32> to vector<64x128xf32>
    %57 = arith.select %53, %56, %40 : vector<64x128xi1>, vector<64x128xf32>
    %c0_24 = arith.constant 0 : index
    %c256 = arith.constant 256 : index
    %58 = vector.load %arg6[%c0_24, %c256] : memref<64x640xbf16, #tpu.memory_space<vmem>>, vector<64x128xbf16>
    %59 = arith.extf %58 : vector<64x128xbf16> to vector<64x128xf32>
    %60 = arith.mulf %15, %59 : vector<64x128xf32>
    %cst_25 = arith.constant dense<0.000000e+00> : vector<64xf32>
    %61 = vector.multi_reduction <add>, %60, %cst_25 [1] : vector<64x128xf32> to vector<64xf32>
    %62 = vector.shape_cast %61 : vector<64xf32> to vector<64x1xf32>
    %63 = arith.mulf %59, %59 : vector<64x128xf32>
    %cst_26 = arith.constant dense<0.000000e+00> : vector<64xf32>
    %64 = vector.multi_reduction <add>, %63, %cst_26 [1] : vector<64x128xf32> to vector<64xf32>
    %65 = vector.shape_cast %64 : vector<64xf32> to vector<64x1xf32>
    %cst_27 = arith.constant 1.000000e-24 : f32
    %66 = vector.broadcast %cst_27 : f32 to vector<64x1xf32>
    %67 = arith.maximumf %65, %66 : vector<64x1xf32>
    %68 = math.rsqrt %67 : vector<64x1xf32>
    %c2_i32 = arith.constant 2 : i32
    %69 = vector.broadcast %c2_i32 : i32 to vector<64x128xi32>
    %70 = arith.cmpi eq, %22, %69 : vector<64x128xi32>
    %71 = arith.mulf %62, %68 : vector<64x1xf32>
    %72 = vector.shape_cast %71 : vector<64x1xf32> to vector<64x1xf32>
    %73 = vector.broadcast %72 : vector<64x1xf32> to vector<64x128xf32>
    %74 = arith.select %70, %73, %57 : vector<64x128xi1>, vector<64x128xf32>
    %c0_28 = arith.constant 0 : index
    %c384 = arith.constant 384 : index
    %75 = vector.load %arg6[%c0_28, %c384] : memref<64x640xbf16, #tpu.memory_space<vmem>>, vector<64x128xbf16>
    %76 = arith.extf %75 : vector<64x128xbf16> to vector<64x128xf32>
    %77 = arith.mulf %15, %76 : vector<64x128xf32>
    %cst_29 = arith.constant dense<0.000000e+00> : vector<64xf32>
    %78 = vector.multi_reduction <add>, %77, %cst_29 [1] : vector<64x128xf32> to vector<64xf32>
    %79 = vector.shape_cast %78 : vector<64xf32> to vector<64x1xf32>
    %80 = arith.mulf %76, %76 : vector<64x128xf32>
    %cst_30 = arith.constant dense<0.000000e+00> : vector<64xf32>
    %81 = vector.multi_reduction <add>, %80, %cst_30 [1] : vector<64x128xf32> to vector<64xf32>
    %82 = vector.shape_cast %81 : vector<64xf32> to vector<64x1xf32>
    %cst_31 = arith.constant 1.000000e-24 : f32
    %83 = vector.broadcast %cst_31 : f32 to vector<64x1xf32>
    %84 = arith.maximumf %82, %83 : vector<64x1xf32>
    %85 = math.rsqrt %84 : vector<64x1xf32>
    %c3_i32 = arith.constant 3 : i32
    %86 = vector.broadcast %c3_i32 : i32 to vector<64x128xi32>
    %87 = arith.cmpi eq, %22, %86 : vector<64x128xi32>
    %88 = arith.mulf %79, %85 : vector<64x1xf32>
    %89 = vector.shape_cast %88 : vector<64x1xf32> to vector<64x1xf32>
    %90 = vector.broadcast %89 : vector<64x1xf32> to vector<64x128xf32>
    %91 = arith.select %87, %90, %74 : vector<64x128xi1>, vector<64x128xf32>
    %c0_32 = arith.constant 0 : index
    %c512 = arith.constant 512 : index
    %92 = vector.load %arg6[%c0_32, %c512] : memref<64x640xbf16, #tpu.memory_space<vmem>>, vector<64x128xbf16>
    %93 = arith.extf %92 : vector<64x128xbf16> to vector<64x128xf32>
    %94 = arith.mulf %15, %93 : vector<64x128xf32>
    %cst_33 = arith.constant dense<0.000000e+00> : vector<64xf32>
    %95 = vector.multi_reduction <add>, %94, %cst_33 [1] : vector<64x128xf32> to vector<64xf32>
    %96 = vector.shape_cast %95 : vector<64xf32> to vector<64x1xf32>
    %97 = arith.mulf %93, %93 : vector<64x128xf32>
    %cst_34 = arith.constant dense<0.000000e+00> : vector<64xf32>
    %98 = vector.multi_reduction <add>, %97, %cst_34 [1] : vector<64x128xf32> to vector<64xf32>
    %99 = vector.shape_cast %98 : vector<64xf32> to vector<64x1xf32>
    %cst_35 = arith.constant 1.000000e-24 : f32
    %100 = vector.broadcast %cst_35 : f32 to vector<64x1xf32>
    %101 = arith.maximumf %99, %100 : vector<64x1xf32>
    %102 = math.rsqrt %101 : vector<64x1xf32>
    %c4_i32 = arith.constant 4 : i32
    %103 = vector.broadcast %c4_i32 : i32 to vector<64x128xi32>
    %104 = arith.cmpi eq, %22, %103 : vector<64x128xi32>
    %105 = arith.mulf %96, %102 : vector<64x1xf32>
    %106 = vector.shape_cast %105 : vector<64x1xf32> to vector<64x1xf32>
    %107 = vector.broadcast %106 : vector<64x1xf32> to vector<64x128xf32>
    %108 = arith.select %104, %107, %91 : vector<64x128xi1>, vector<64x128xf32>
    %cst_36 = arith.constant 1.000000e+00 : f32
    %109 = vector.broadcast %cst_36 : f32 to vector<64x1xf32>
    %110 = arith.mulf %21, %109 : vector<64x1xf32>
    %111 = vector.broadcast %110 : vector<64x1xf32> to vector<64x128xf32>
    %112 = arith.mulf %108, %111 : vector<64x128xf32>
    %c0_37 = arith.constant 0 : index
    %c0_38 = arith.constant 0 : index
    %113 = vector.load %arg7[%c0_37, %c0_38] : memref<64x128xf32, #tpu.memory_space<vmem>>, vector<64x128xf32>
    tpu.vector_store %arg7[%c0_37, %c0_38], %112 {strides = array<i32>} : memref<64x128xf32, #tpu.memory_space<vmem>>, vector<64x128xf32>,
    return
  }
  func.func @transform_0(%arg0: i32) -> (i32, i32) {
    %c0_i32 = arith.constant 0 : i32
    %c0_i32_0 = arith.constant 0 : i32
    return %arg0, %c0_i32 : i32, i32
  }
  func.func @transform_1(%arg0: i32) -> (i32, i32) {
    %c0_i32 = arith.constant 0 : i32
    %c0_i32_0 = arith.constant 0 : i32
    %c0_i32_1 = arith.constant 0 : i32
    return %c0_i32, %c0_i32_0 : i32, i32
  }
  func.func @transform_2(%arg0: i32) -> (i32, i32) {
    %c0_i32 = arith.constant 0 : i32
    %c0_i32_0 = arith.constant 0 : i32
    %c0_i32_1 = arith.constant 0 : i32
    return %c0_i32, %c0_i32_0 : i32, i32
  }
  func.func @transform_3(%arg0: i32) -> (i32, i32) {
    %c0_i32 = arith.constant 0 : i32
    %c0_i32_0 = arith.constant 0 : i32
    %c0_i32_1 = arith.constant 0 : i32
    return %c0_i32, %c0_i32_0 : i32, i32
  }
  func.func @transform_4(%arg0: i32) -> (i32, i32) {
    %c0_i32 = arith.constant 0 : i32
    %c0_i32_0 = arith.constant 0 : i32
    %c0_i32_1 = arith.constant 0 : i32
    return %c0_i32, %c0_i32_0 : i32, i32
  }
  func.func @transform_5(%arg0: i32) -> (i32, i32) {
    %c0_i32 = arith.constant 0 : i32
    %c0_i32_0 = arith.constant 0 : i32
    return %arg0, %c0_i32 : i32, i32
  }
  func.func @transform_6(%arg0: i32) -> (i32, i32) {
    %c0_i32 = arith.constant 0 : i32
    %c0_i32_0 = arith.constant 0 : i32
    return %arg0, %c0_i32 : i32, i32
  }
}

</mosaic_0001>

<bundles_post_ra>
// kernel: forward.1
= control target key start
LH: loop header
LB: loop body
LE: loop exit
PB: predicated region body
PF: predicated region fallthrough
CT: control target
= control target key end

     0   :  { %s1439_s21 = smov 0   ;;  %s1977_s0 = inlined_call_operand.vmem [shape: bf16[256,48], index: 0, kind: input, shape index: {}]   ;;  %s1978_s1 = inlined_call_operand.vmem [shape: bf16[48,128], index: 1, kind: input, shape index: {}]   ;;  %s1979_s2 = inlined_call_operand.vmem [shape: f32[1,128], index: 2, kind: input, shape index: {}, may-alias: {2,4}]   ;;  %s1980_s3 = inlined_call_operand.vmem [shape: bf16[128,128], index: 3, kind: input, shape index: {}]   ;;  %s1981_s4 = inlined_call_operand.vmem [shape: f32[1,128], index: 4, kind: input, shape index: {}, may-alias: {2,4}]   ;;  %s1982_s5 = inlined_call_operand.vmem [shape: bf16[256,640], index: 5, kind: input, shape index: {}]   ;;  %s1983_s6 = inlined_call_operand.vmem [shape: f32[256,128], index: 6, kind: output, shape index: {}]  }
   0x1 LB: > { %s1185_s22 = sadd.s32 4294967295, %s1402_s21   ;;  %p1189_p0 = scmp.ge.s32.totalorder %s1402_s21, 1  ;;  %s1402_s21 = sphi %s1439_s21, %s16_s21  }
   0x2   : > { %p225_p1 = scmp.lt.s32.totalorder %s1402_s21, 5 }
   0x4   : > { %p226_p2 = pnand %p1189_p0, %p225_p1 }
   0x5   : > { %v1285_v0 = vld [vmem:[%s1978_s1] sm:$0xff] (!%p226_p2)   ;;  %s1190_s25 = sshll.u32 (!%p226_p2), %s1185_s22, 3  ;;  %v1286_v1 = vld [vmem:[%s1978_s1 + $0x8] sm:$0xff] (!%p226_p2)   ;;  %v1287_v2 = vld [vmem:[%s1978_s1 + $0x10] sm:$0xff] (!%p226_p2)   ;;  %vm340_vm0 = vcmask (!%p226_p2), 392192  }
   0x6   : > { %229 = sbr.rel (%p226_p2) target bundleno = 698 (0x2ba), region = 44  ;;  %p262_p3 = scmp.lt.s32.totalorder (!%p226_p2), %s1190_s25, 31  ;;  %1238 = vmatprep.subr.bf16.mxu0 (!%p226_p2), %v1285_v0  ;;  %v1292_v3 = vld [vmem:[%s1980_s3] sm:$0xff] (!%p226_p2)   ;;  %v1293_v4 = vld [vmem:[%s1980_s3 + $0x8] sm:$0xff] (!%p226_p2)   ;;  %v1294_v5 = vld [vmem:[%s1980_s3 + $0x10] sm:$0xff] (!%p226_p2)  }
   0x7   : > { %1239 = vmatpush3.bf16.msra.mxu0 (!%p226_p2), %v1285_v0  ;;  %1252 = vmatprep.subr.bf16.mxu1 (!%p226_p2), %v1292_v3  ;;  %v1295_v9 = vld [vmem:[%s1980_s3 + $0x18] sm:$0xff] (!%p226_p2)   ;;  %v1296_v10 = vld [vmem:[%s1980_s3 + $0x20] sm:$0xff] (!%p226_p2)   ;;  %v1297_v12 = vld [vmem:[%s1980_s3 + $0x28] sm:$0xff] (!%p226_p2)  }
   0x8   : > { %1240 = vmatprep.subr.bf16.mxu0 (!%p226_p2), %v1286_v1  ;;  %1253 = vmatpush3.bf16.msra.mxu1 (!%p226_p2), %v1292_v3  ;;  %v1298_v13 = vld [vmem:[%s1980_s3 + $0x30] sm:$0xff] (!%p226_p2)   ;;  %v1299_v14 = vld [vmem:[%s1980_s3 + $0x38] sm:$0xff] (!%p226_p2)  }
   0x9   : > { %1254 = vmatprep.subr.bf16.mxu1 (!%p226_p2), %v1293_v4 }
   0xb   : > { %1241 = vmatpush3.bf16.msra.mxu0 (!%p226_p2), %v1286_v1 }
   0xc   : > { %1242 = vmatprep.subr.bf16.mxu0 (!%p226_p2), %v1287_v2  ;;  %1255 = vmatpush3.bf16.msra.mxu1 (!%p226_p2), %v1293_v4 }
   0xd   : > { %s1985_s25 = smov (!%p262_p3, %s1190_s25), 31  ;;  %1256 = vmatprep.subr.bf16.mxu1 %v1294_v5 }
   0xe   : > { %s1191_s10 = sshll.u32 %s1985_s25, 2  ;;  %s1276_s28 = smul.u32 20, %s1985_s25 }
   0xf   : > { %s265_s13 = scalar_lea.vmem %s1977_s0, %s1191_s10  ;;  %1243 = vmatpush3.bf16.msra.mxu0 %v1287_v2  ;;  %s1195_s12 = sshll.u32 %s1985_s25, 3 }
  0x10   : > { %v1288_v6 = vld [vmem:[%s265_s13] sm:$0xff]   ;;  %v1289_v7 = vld [vmem:[%s265_s13 + $0x8] sm:$0xff]   ;;  %v1290_v8 = vld [vmem:[%s265_s13 + $0x10] sm:$0xff]   ;;  %1257 = vmatpush3.bf16.msra.mxu1 %v1294_v5  ;;  %s1494_s7 = scalar_lea.vmem %s1982_s5, %s1276_s28  ;;  %s1859_s14 = scalar_lea.vmem %s1983_s6, %s1195_s12 }
  0x11   : > { %1244 = vmatprep.mubr.msk.bf16.mxu0 %vm340_vm0, %v1288_v6  ;;  %1258 = vmatprep.subr.bf16.mxu1 %v1295_v9  ;;  %v1291_v11 = vld [vmem:[%s265_s13 + $0x18] sm:$0xff]   ;;  %v616_v16 = vld [vmem:[%s1494_s7] sm:$0xff]   ;;  %v618_v21 = vld [vmem:[%s1494_s7 + $0x28] sm:$0xff]  }
  0x12   : > { %1245 = vmatmul.mubr.msk.bf16.vlgmr.msra.gmra.mrb[0].mxu0 %vm340_vm0, %v1289_v7  ;;  %v617_v15 = vld [vmem:[%s1494_s7 + $0x14] sm:$0xff]   ;;  %v619_v17 = vld [vmem:[%s1494_s7 + $0x3c] sm:$0xff]   ;;  %v1501_v19 = vunpack.c.l.bf16 %v616_v16  ;;  %v1506_v22 = vunpack.c.l.bf16 %v618_v21  ;;  %v621_v23 = vld [vmem:[%s1494_s7 + $0x64] sm:$0xff]   ;;  %v1538_v40 = vunpack.c.h.bf16 %v616_v16  ;;  %v1546_v44 = vunpack.c.h.bf16 %v618_v21 }
  0x13   : > { %1248 = vmatprep.mubr.msk.bf16.mxu0 %vm340_vm0, %v1290_v8  ;;  %v1499_v18 = vunpack.c.l.bf16 %v617_v15  ;;  %v1503_v20 = vunpack.c.l.bf16 %v619_v17  ;;  %v620_v24 = vld [vmem:[%s1494_s7 + $0x50] sm:$0xff]   ;;  %v1518_v29 = vunpack.c.l.bf16 %v621_v23  ;;  %v622_v32 = vld [vmem:[%s1494_s7 + $0x78] sm:$0xff]   ;;  %v1536_v39 = vunpack.c.h.bf16 %v617_v15  ;;  %v810_v54 = vld [vmem:[%s1494_s7 + $0x8] sm:$0xff]  }
  0x14   : > { %1259 = vmatpush3.bf16.msra.mxu1 %v1295_v9  ;;  %v656_v26 = vmul.f32 %v1501_v19, %v1501_v19  ;;  %v658_v28 = vmul.f32 %v1506_v22, %v1506_v22  ;;  %v1520_v30 = vunpack.c.l.bf16 %v620_v24  ;;  %v623_v31 = vld [vmem:[%s1494_s7 + $0x8c] sm:$0xff]   ;;  %v1530_v36 = vunpack.c.l.bf16 %v622_v32  ;;  %v811_v53 = vld [vmem:[%s1494_s7 + $0x1c] sm:$0xff]   ;;  %v813_v59 = vld [vmem:[%s1494_s7 + $0x44] sm:$0xff]  }
  0x15   : > { %1260 = vmatprep.subr.bf16.mxu1 %v1296_v10  ;;  %v657_v25 = vmul.f32 %v1499_v18, %v1499_v18  ;;  %v659_v27 = vmul.f32 %v1503_v20, %v1503_v20  ;;  %v661_v33 = vmul.f32 %v1518_v29, %v1518_v29  ;;  %v1528_v35 = vunpack.c.l.bf16 %v623_v31  ;;  %v812_v60 = vld [vmem:[%s1494_s7 + $0x30] sm:$0xff]   ;;  %v814_v2 = vld [vmem:[%s1494_s7 + $0x58] sm:$0xff]   ;;  %v816_v8 = vld [vmem:[%s1494_s7 + $0x80] sm:$0xff]  }
  0x16   : > { %664 = vadd.xlane.f32.xlu0 %v656_v26  ;;  %v660_v34 = vmul.f32 %v1520_v30, %v1520_v30  ;;  %v662_v38 = vmul.f32 %v1530_v36, %v1530_v36  ;;  %v754_v41 = vmul.f32 %v1536_v39, %v1536_v39  ;;  %v753_v42 = vmul.f32 %v1538_v40, %v1538_v40  ;;  %v815_v1 = vld [vmem:[%s1494_s7 + $0x6c] sm:$0xff]   ;;  %v817_v7 = vld [vmem:[%s1494_s7 + $0x94] sm:$0xff]  }
  0x17   : > { %666 = vadd.xlane.f32.xlu1 %v657_v25  ;;  %v663_v37 = vmul.f32 %v1528_v35, %v1528_v35  ;;  %v1544_v43 = vunpack.c.h.bf16 %v619_v17  ;;  %v755_v46 = vmul.f32 %v1546_v44, %v1546_v44  ;;  %v1552_v47 = vunpack.c.h.bf16 %v621_v23 }
  0x18   : > { %1261 = vmatpush3.bf16.msra.mxu1 %v1296_v10  ;;  %v1554_v48 = vunpack.c.h.bf16 %v620_v24  ;;  %v1560_v51 = vunpack.c.h.bf16 %v623_v31  ;;  %v1562_v52 = vunpack.c.h.bf16 %v622_v32  ;;  %v1570_v57 = vunpack.c.l.bf16 %v811_v53 }
  0x19   : > { %1262 = vmatprep.subr.bf16.mxu1 %v1297_v12  ;;  %v756_v45 = vmul.f32 %v1544_v43, %v1544_v43  ;;  %v758_v49 = vmul.f32 %v1552_v47, %v1552_v47  ;;  %v1572_v58 = vunpack.c.l.bf16 %v810_v54  ;;  %v1580_v63 = vunpack.c.l.bf16 %v813_v59 }
  0x1a   : > { %1249 = vmatmul.mubr.msk.bf16.gmra.mrb[4].mxu0 %vm340_vm0, %v1291_v11  ;;  %668 = vadd.xlane.f32.xlu0 %v658_v28  ;;  %v757_v50 = vmul.f32 %v1554_v48, %v1554_v48  ;;  %v760_v55 = vmul.f32 %v1560_v51, %v1560_v51  ;;  %v759_v56 = vmul.f32 %v1562_v52, %v1562_v52  ;;  %v1582_v0 = vunpack.c.l.bf16 %v812_v60 }
  0x1b   : > { %670 = vadd.xlane.f32.xlu1 %v659_v27  ;;  %v851_v61 = vmul.f32 %v1570_v57, %v1570_v57  ;;  %v850_v62 = vmul.f32 %v1572_v58, %v1572_v58  ;;  %v853_v3 = vmul.f32 %v1580_v63, %v1580_v63  ;;  %v1590_v5 = vunpack.c.l.bf16 %v815_v1 }
  0x1c   : > { %1263 = vmatpush3.bf16.msra.mxu1 %v1297_v12  ;;  %v852_v4 = vmul.f32 %v1582_v0, %v1582_v0  ;;  %v1592_v6 = vunpack.c.l.bf16 %v814_v2  ;;  %v1600_v11 = vunpack.c.l.bf16 %v817_v7  ;;  %v1602_v12 = vunpack.c.l.bf16 %v816_v8 }
  0x1d   : > { %1264 = vmatprep.subr.bf16.mxu1 %v1298_v13  ;;  %v855_v9 = vmul.f32 %v1590_v5, %v1590_v5  ;;  %v1608_v15 = vunpack.c.h.bf16 %v811_v53  ;;  %v1610_v16 = vunpack.c.h.bf16 %v810_v54  ;;  %v1616_v23 = vunpack.c.h.bf16 %v813_v59 }
  0x1e   : > { %672 = vadd.xlane.f32.xlu0 %v660_v34  ;;  %v854_v10 = vmul.f32 %v1592_v6, %v1592_v6  ;;  %v1618_v24 = vunpack.c.h.bf16 %v812_v60  ;;  %v1624_v27 = vunpack.c.h.bf16 %v815_v1  ;;  %v1626_v28 = vunpack.c.h.bf16 %v814_v2  ;;  %v1196_v2 = vld [vmem:[%s1979_s2] ss:$0 sm:$0xff] }
  0x1f   : > { %674 = vadd.xlane.f32.xlu1 %v661_v33  ;;  %v948_v17 = vmul.f32 %v1608_v15, %v1608_v15  ;;  %v947_v21 = vmul.f32 %v1610_v16, %v1610_v16  ;;  %v950_v25 = vmul.f32 %v1616_v23, %v1616_v23  ;;  %v1632_v33 = vunpack.c.h.bf16 %v817_v7 }
  0x20   : > { %1265 = vmatpush3.bf16.msra.mxu1 %v1298_v13  ;;  %v857_v13 = vmul.f32 %v1600_v11, %v1600_v11  ;;  %v949_v26 = vmul.f32 %v1618_v24, %v1618_v24  ;;  %v952_v31 = vmul.f32 %v1624_v27, %v1624_v27  ;;  %v951_v32 = vmul.f32 %v1626_v28, %v1626_v28 }
  0x21   : > { %1266 = vmatprep.subr.bf16.mxu1 %v1299_v14  ;;  %v1634_v34 = vunpack.c.h.bf16 %v816_v8 }
  0x22   : > { %676 = vadd.xlane.f32.xlu0 %v662_v38  ;;  %v954_v38 = vmul.f32 %v1632_v33, %v1632_v33 }
  0x23   : > { %678 = vadd.xlane.f32.xlu1 %v663_v37  ;;  %v1005_v37 = vld [vmem:[%s1494_s7 + $0x10] ss:$20 sps:$4 sm:$0xff]  }
  0x24   : > { %1267 = vmatpush3.bf16.msra.mxu1 %v1299_v14  ;;  %v856_v14 = vmul.f32 %v1602_v12, %v1602_v12 }
  0x26   : > { %761 = vadd.xlane.f32.xlu0 %v753_v42  ;;  %v1641_v42 = vunpack.c.h.bf16 %v1005_v37 }
  0x27   : > { %763 = vadd.xlane.f32.xlu1 %v754_v41  ;;  %v953_v41 = vmul.f32 %v1634_v34, %v1634_v34 }
  0x2a   : > { %765 = vadd.xlane.f32.xlu0 %v755_v46  ;;  %v1007_v46 = vld [vmem:[%s1494_s7 + $0x38] ss:$20 sps:$4 sm:$0xff]  }
  0x2b   : > { %767 = vadd.xlane.f32.xlu1 %v756_v45  ;;  %v1643_v45 = vunpack.c.l.bf16 %v1005_v37  ;;  %v1650_v53 = vunpack.c.h.bf16 %v1007_v46  ;;  %v1652_v54 = vunpack.c.l.bf16 %v1007_v46 }
  0x2d   : > { %v1046_v59 = vmul.f32 %v1652_v54, %v1652_v54 }
  0x2e   : > { %769 = vadd.xlane.f32.xlu0 %v757_v50  ;;  %v1044_v50 = vmul.f32 %v1643_v45, %v1643_v45 }
  0x2f   : > { %771 = vadd.xlane.f32.xlu1 %v758_v49  ;;  %v1045_v49 = vmul.f32 %v1641_v42, %v1641_v42 }
  0x32   : > { %773 = vadd.xlane.f32.xlu0 %v759_v56  ;;  %v1047_v56 = vmul.f32 %v1650_v53, %v1650_v53 }
  0x33   : > { %775 = vadd.xlane.f32.xlu1 %v760_v55  ;;  %v1009_v55 = vld [vmem:[%s1494_s7 + $0x60] ss:$20 sps:$4 sm:$0xff]  }
  0x34   : > { %v1659_v60 = vunpack.c.h.bf16 %v1009_v55 }
  0x36   : > { %858 = vadd.xlane.f32.xlu0 %v850_v62  ;;  %v1049_v62 = vmul.f32 %v1659_v60, %v1659_v60 }
  0x37   : > { %860 = vadd.xlane.f32.xlu1 %v851_v61  ;;  %v1661_v61 = vunpack.c.l.bf16 %v1009_v55 }
  0x39   : > { %v1048_v1 = vmul.f32 %v1661_v61, %v1661_v61 }
  0x3a   : > { %862 = vadd.xlane.f32.xlu0 %v852_v4 }
  0x3b   : > { %864 = vadd.xlane.f32.xlu1 %v853_v3 }
  0x3e   : > { %866 = vadd.xlane.f32.xlu0 %v854_v10 }
  0x3f   : > { %868 = vadd.xlane.f32.xlu1 %v855_v9 }
  0x42   : > { %870 = vadd.xlane.f32.xlu0 %v856_v14 }
  0x43   : > { %872 = vadd.xlane.f32.xlu1 %v857_v13 }
  0x46   : > { %955 = vadd.xlane.f32.xlu0 %v947_v21 }
  0x47   : > { %957 = vadd.xlane.f32.xlu1 %v948_v17 }
  0x4a   : > { %959 = vadd.xlane.f32.xlu0 %v949_v26 }
  0x4b   : > { %961 = vadd.xlane.f32.xlu1 %v950_v25 }
  0x4e   : > { %963 = vadd.xlane.f32.xlu0 %v951_v32 }
  0x4f   : > { %965 = vadd.xlane.f32.xlu1 %v952_v31 }
  0x52   : > { %967 = vadd.xlane.f32.xlu0 %v953_v41 }
  0x53   : > { %969 = vadd.xlane.f32.xlu1 %v954_v38 }
  0x56   : > { %1052 = vadd.xlane.f32.xlu0 %v1044_v50 }
  0x57   : > { %1054 = vadd.xlane.f32.xlu1 %v1045_v49 }
  0x5a   : > { %1056 = vadd.xlane.f32.xlu0 %v1046_v59 }
  0x5b   : > { %1058 = vadd.xlane.f32.xlu1 %v1047_v56 }
  0x5e   : > { %1060 = vadd.xlane.f32.xlu0 %v1048_v1 }
  0x5f   : > { %1062 = vadd.xlane.f32.xlu1 %v1049_v62 }
  0xe5   : > { %v1246_v3 = vpop.f32.mrb[0].mxu0 }
  0xe6   : > { %v396_v4 = vadd.f32 %v1246_v3, %v1196_v2  ;;  %v387_v7 = vpop.f32.mrb[1].mxu0 }
  0xe7   : > { %v388_v8 = vadd.f32 %v1196_v2, %v387_v7  ;;  %v1247_v9 = vpop.f32.mrb[2].mxu0 }
  0xe8   : > { %v399_v10 = vadd.f32 %v1247_v9, %v1196_v2  ;;  %v390_v13 = vpop.f32.mrb[3].mxu0  ;;  %v420_v17 = vmax.f32 %v396_v4, 0.0 }
  0xe9   : > { %v391_v14 = vadd.f32 %v1196_v2, %v390_v13  ;;  %v418_v25 = vmax.f32 %v388_v8, 0.0  ;;  %v1011_v8 = vld [vmem:[%s1494_s7 + $0x88] ss:$20 sps:$4 sm:$0xff]  }
  0xea   : > { %v421_v21 = vmax.f32 %v399_v10, 0.0  ;;  %v1671_v9 = vunpack.c.h.bf16 %v1011_v8  ;;  %v1673_v10 = vunpack.c.l.bf16 %v1011_v8 }
  0xeb   : > { %v419_v26 = vmax.f32 %v391_v14, 0.0 }
  0xec   : > { %v427_v31 = vpack.c.bf16 %v421_v21, %v420_v17  ;;  %v1051_v13 = vmul.f32 %v1671_v9, %v1671_v9  ;;  %v1050_v14 = vmul.f32 %v1673_v10, %v1673_v10 }
  0xed   : > { %v426_v32 = vpack.c.bf16 %v419_v26, %v418_v25  ;;  %v1250_v37 = vpop.f32.mrb[4].mxu0 }
  0xee   : > { %v412_v38 = vadd.f32 %v1250_v37, %v1196_v2  ;;  %v403_v41 = vpop.f32.mrb[5].mxu0  ;;  %1066 = vadd.xlane.f32.xlu1 %v1051_v13  ;;  %1064 = vadd.xlane.f32.xlu0 %v1050_v14 }
  0xef   : > { %1268 = vmatprep.mubr.bf16.mxu1 %v426_v32  ;;  %v404_v46 = vadd.f32 %v1196_v2, %v403_v41  ;;  %v1251_v49 = vpop.f32.mrb[6].mxu0 }
  0xf0   : > { %1269 = vmatmul.mubr.bf16.vlgmr.msra.gmra.mrb[0].mxu1 %v427_v31  ;;  %v424_v50 = vmax.f32 %v412_v38, 0.0  ;;  %v415_v55 = vadd.f32 %v1251_v49, %v1196_v2  ;;  %v406_v56 = vpop.f32.mrb[7].mxu0 }
  0xf1   : > { %v422_v59 = vmax.f32 %v404_v46, 0.0  ;;  %v407_v62 = vadd.f32 %v1196_v2, %v406_v56  ;;  %v1682_v2 = vld [vmem:[%s1981_s4] ss:$0 sm:$0xff] }
  0xf2   : > { %v425_v1 = vmax.f32 %v415_v55, 0.0 }
  0xf3   : > { %v423_v3 = vmax.f32 %v407_v62, 0.0 }
  0xf4   : > { %v429_v4 = vpack.c.bf16 %v425_v1, %v424_v50 }
  0xf5   : > { %v428_v7 = vpack.c.bf16 %v423_v3, %v422_v59 }
  0xf7   : > { %1272 = vmatprep.mubr.bf16.mxu1 %v428_v7 }
  0xf8   : > { %1273 = vmatmul.mubr.bf16.gmra.mrb[4].mxu1 %v429_v4 }
 0x1c3   : > { %v1270_v17 = vpop.f32.mrb[0].mxu1 }
 0x1c4   : > { %v544_v21 = vadd.f32 %v1270_v17, %v1682_v2  ;;  %v535_v25 = vpop.f32.mrb[1].mxu1 }
 0x1c5   : > { %v1271_v26 = vpop.f32.mrb[2].mxu1 }
 0x1c6   : > { %v568_v31 = vmax.f32 %v544_v21, 0.0  ;;  %v547_v32 = vadd.f32 %v1271_v26, %v1682_v2  ;;  %v538_v37 = vpop.f32.mrb[3].mxu1 }
 0x1c8   : > { %v569_v38 = vmax.f32 %v547_v32, 0.0  ;;  %v634_v41 = vmul.f32 %v1506_v22, %v568_v31  ;;  %v576_v46 = vmul.f32 %v568_v31, %v568_v31  ;;  %v731_v50 = vmul.f32 %v1546_v44, %v568_v31 }
 0x1c9   : > { %v828_v22 = vmul.f32 %v1582_v0, %v568_v31  ;;  %v536_v44 = vadd.f32 %v1682_v2, %v535_v25  ;;  %v925_v7 = vmul.f32 %v1618_v24, %v568_v31  ;;  %v1022_v14 = vmul.f32 %v1652_v54, %v568_v31  ;;  %v1703_v25 = vpop.xlane.xlu1 %666  ;;  %v1705_v24 = vpop.xlane.xlu0 %664 }
 0x1ca   : > { %644 = vadd.xlane.f32.xlu0 %v634_v41  ;;  %586 = vadd.xlane.f32.xlu1 %v576_v46  ;;  %v577_v55 = vmul.f32 %v569_v38, %v569_v38  ;;  %v635_v4 = vmul.f32 %v1503_v20, %v569_v38  ;;  %v732_v8 = vmul.f32 %v1544_v43, %v569_v38 }
 0x1cb   : > { %v1274_v49 = vpop.f32.mrb[4].mxu1  ;;  %v566_v13 = vmax.f32 %v536_v44, 0.0  ;;  %v829_v17 = vmul.f32 %v1580_v63, %v569_v38  ;;  %v539_v0 = vadd.f32 %v1682_v2, %v538_v37  ;;  %v926_v20 = vmul.f32 %v1616_v23, %v569_v38 }
 0x1cc   : > { %v551_v56 = vpop.f32.mrb[5].mxu1  ;;  %v1023_v26 = vmul.f32 %v1650_v53, %v569_v38  ;;  %v560_v38 = vadd.f32 %v1274_v49, %v1682_v2 }
 0x1cd   : > { %v1689_v59 = vadd.f32 %v1682_v2, %v551_v56  ;;  %v1275_v62 = vpop.f32.mrb[6].mxu1  ;;  %v574_v21 = vmul.f32 %v566_v13, %v566_v13  ;;  %v567_v43 = vmax.f32 %v539_v0, 0.0  ;;  %v632_v54 = vmul.f32 %v1501_v19, %v566_v13  ;;  %v1711_v32 = vpop.xlane.xlu1 %670 }
 0x1ce   : > { %741 = vadd.xlane.f32.xlu0 %v731_v50  ;;  %588 = vadd.xlane.f32.xlu1 %v577_v55  ;;  %v554_v1 = vpop.f32.mrb[7].mxu1  ;;  %v729_v31 = vmul.f32 %v1538_v40, %v566_v13  ;;  %v1713_v23 = vpop.xlane.xlu0 %668  ;;  %v826_v41 = vmul.f32 %v1572_v58, %v566_v13  ;;  %v923_v40 = vmul.f32 %v1610_v16, %v566_v13  ;;  %v1731_v56 = vmax.f32 %v560_v38, 0.0 }
 0x1cf   : > { %v1692_v3 = vadd.f32 %v1682_v2, %v554_v1  ;;  %v633_v63 = vmul.f32 %v1499_v18, %v567_v43  ;;  %v730_v37 = vmul.f32 %v1536_v39, %v567_v43  ;;  %v827_v18 = vmul.f32 %v1570_v57, %v567_v43 }
 0x1d0   : > { %v563_v46 = vadd.f32 %v1275_v62, %v1682_v2  ;;  %v924_v39 = vmul.f32 %v1608_v15, %v567_v43  ;;  %v1020_v58 = vmul.f32 %v1643_v45, %v566_v13  ;;  %v1021_v16 = vmul.f32 %v1641_v42, %v567_v43 }
 0x1d1   : > { %v1717_v53 = vpop.xlane.xlu1 %674  ;;  %v575_v1 = vmul.f32 %v567_v43, %v567_v43  ;;  %v580_v49 = vmul.f32 %v1731_v56, %v1731_v56  ;;  %v638_v42 = vmul.f32 %v1530_v36, %v1731_v56  ;;  %v832_v13 = vmul.f32 %v1602_v12, %v1731_v56 }
 0x1d2   : > { %838 = vadd.xlane.f32.xlu0 %v828_v22  ;;  %646 = vadd.xlane.f32.xlu1 %v635_v4  ;;  %v1719_v19 = vpop.xlane.xlu0 %672  ;;  %v1733_v57 = vmax.f32 %v563_v46, 0.0 }
 0x1d4   : > { %v581_v45 = vmul.f32 %v1733_v57, %v1733_v57  ;;  %v639_v62 = vmul.f32 %v1528_v35, %v1733_v57  ;;  %v736_v44 = vmul.f32 %v1560_v51, %v1733_v57  ;;  %v833_v36 = vmul.f32 %v1600_v11, %v1733_v57 }
 0x1d5   : > { %v1727_v50 = vpop.xlane.xlu1 %678  ;;  %v571_v51 = vmax.f32 %v1692_v3, 0.0 }
 0x1d6   : > { %935 = vadd.xlane.f32.xlu0 %v925_v7  ;;  %743 = vadd.xlane.f32.xlu1 %v732_v8  ;;  %v1729_v55 = vpop.xlane.xlu0 %676  ;;  %v735_v7 = vmul.f32 %v1562_v52, %v1731_v56  ;;  %v930_v52 = vmul.f32 %v1632_v33, %v1733_v57 }
 0x1d7   : > { %v579_v11 = vmul.f32 %v571_v51, %v571_v51  ;;  %v637_v3 = vmul.f32 %v1518_v29, %v571_v51 }
 0x1d9   : > { %v1736_v2 = vpop.xlane.xlu1 %763 }
 0x1da   : > { %1032 = vadd.xlane.f32.xlu0 %v1022_v14  ;;  %840 = vadd.xlane.f32.xlu1 %v829_v17  ;;  %v1738_v15 = vpop.xlane.xlu0 %761  ;;  %v570_v14 = vmax.f32 %v1689_v59, 0.0  ;;  %v929_v17 = vmul.f32 %v1634_v34, %v1731_v56  ;;  %v734_v34 = vmul.f32 %v1552_v47, %v571_v51 }
 0x1dc   : > { %v578_v12 = vmul.f32 %v570_v14, %v570_v14  ;;  %v636_v33 = vmul.f32 %v1520_v30, %v570_v14  ;;  %v733_v43 = vmul.f32 %v1554_v48, %v570_v14  ;;  %v927_v47 = vmul.f32 %v1626_v28, %v570_v14 }
 0x1dd   : > { %v1748_v22 = vpop.xlane.xlu1 %767  ;;  %v1025_v48 = vmul.f32 %v1659_v60, %v571_v51 }
 0x1de   : > { %937 = vadd.xlane.f32.xlu1 %v926_v20  ;;  %582 = vadd.xlane.f32.xlu0 %v574_v21  ;;  %v1750_v4 = vpop.xlane.xlu0 %765 }
 0x1e1   : > { %v1756_v8 = vpop.xlane.xlu1 %771 }
 0x1e2   : > { %1034 = vadd.xlane.f32.xlu1 %v1023_v26  ;;  %640 = vadd.xlane.f32.xlu0 %v632_v54  ;;  %v1758_v35 = vpop.xlane.xlu0 %769 }
 0x1e5   : > { %v1770_v0 = vpop.xlane.xlu1 %775 }
 0x1e6   : > { %642 = vadd.xlane.f32.xlu1 %v633_v63  ;;  %737 = vadd.xlane.f32.xlu0 %v729_v31  ;;  %v1772_v20 = vpop.xlane.xlu0 %773  ;;  %v831_v63 = vmul.f32 %v1590_v5, %v571_v51  ;;  %v830_v31 = vmul.f32 %v1592_v6, %v570_v14  ;;  %v1027_v6 = vmul.f32 %v1671_v9, %v1733_v57 }
 0x1e9   : > { %v1774_v21 = vpop.xlane.xlu1 %860 }
 0x1ea   : > { %739 = vadd.xlane.f32.xlu1 %v730_v37  ;;  %834 = vadd.xlane.f32.xlu0 %v826_v41  ;;  %v1776_v59 = vpop.xlane.xlu0 %858  ;;  %v928_v37 = vmul.f32 %v1624_v27, %v571_v51  ;;  %v1024_v41 = vmul.f32 %v1661_v61, %v570_v14  ;;  %v1026_v27 = vmul.f32 %v1673_v10, %v1731_v56 }
 0x1ed   : > { %v1782_v26 = vpop.xlane.xlu1 %864 }
 0x1ee   : > { %836 = vadd.xlane.f32.xlu1 %v827_v18  ;;  %931 = vadd.xlane.f32.xlu0 %v923_v40  ;;  %v863_v54 = vpop.xlane.xlu0 %862 }
 0x1f1   : > { %v1786_v29 = vpop.xlane.xlu1 %868 }
 0x1f2   : > { %933 = vadd.xlane.f32.xlu1 %v924_v39  ;;  %1028 = vadd.xlane.f32.xlu0 %v1020_v58  ;;  %v1788_v30 = vpop.xlane.xlu0 %866 }
 0x1f5   : > { %v1794_v18 = vpop.xlane.xlu1 %872 }
 0x1f6   : > { %1030 = vadd.xlane.f32.xlu1 %v1021_v16  ;;  %584 = vadd.xlane.f32.xlu0 %v575_v1  ;;  %v1796_v5 = vpop.xlane.xlu0 %870 }
 0x1f9   : > { %v1802_v28 = vpop.xlane.xlu1 %957 }
 0x1fa   : > { %596 = vadd.xlane.f32.xlu1 %v581_v45  ;;  %594 = vadd.xlane.f32.xlu0 %v580_v49  ;;  %v1804_v40 = vpop.xlane.xlu0 %955  ;;  %v683_v45 = vmax.f32 %v1711_v32, 1e-24 }
 0x1fc   : > { %1300 = vrsqrt.f32 %v683_v45 }
 0x1fd   : > { %v962_v60 = vpop.xlane.xlu1 %961 }
 0x1fe   : > { %654 = vadd.xlane.f32.xlu1 %v639_v62  ;;  %652 = vadd.xlane.f32.xlu0 %v638_v42  ;;  %v960_v61 = vpop.xlane.xlu0 %959  ;;  %v682_v42 = vmax.f32 %v1713_v23, 1e-24  ;;  %v877_v23 = vmax.f32 %v1782_v26, 1e-24  ;;  %v681_v26 = vmax.f32 %v1703_v25, 1e-24 }
 0x200   : > { %1302 = vrsqrt.f32 %v682_v42 }
 0x201   : > { %v1806_v38 = vpop.xlane.xlu1 %965 }
 0x202   : > { %751 = vadd.xlane.f32.xlu1 %v736_v44  ;;  %749 = vadd.xlane.f32.xlu0 %v735_v7  ;;  %v1808_v46 = vpop.xlane.xlu0 %963  ;;  %v780_v44 = vmax.f32 %v1748_v22, 1e-24  ;;  %v779_v7 = vmax.f32 %v1750_v4, 1e-24  ;;  %v974_v22 = vmax.f32 %v962_v60, 1e-24 }
 0x204   : > { %1304 = vrsqrt.f32 %v780_v44 }
 0x205   : > { %v1810_v39 = vpop.xlane.xlu1 %969  ;;  %1306 = vrsqrt.f32 %v779_v7 }
 0x206   : > { %848 = vadd.xlane.f32.xlu1 %v833_v36  ;;  %846 = vadd.xlane.f32.xlu0 %v832_v13  ;;  %v1812_v58 = vpop.xlane.xlu0 %967  ;;  %v876_v36 = vmax.f32 %v863_v54, 1e-24  ;;  %v973_v13 = vmax.f32 %v960_v61, 1e-24  ;;  %v1301_v4 = vpop.eup %1300 }
 0x208   : > { %1308 = vrsqrt.f32 %v876_v36 }
 0x209   : > { %v1814_v9 = vpop.xlane.xlu1 %1054  ;;  %1310 = vrsqrt.f32 %v973_v13 }
 0x20a   : > { %945 = vadd.xlane.f32.xlu1 %v930_v52  ;;  %943 = vadd.xlane.f32.xlu0 %v929_v17  ;;  %v1816_v57 = vpop.xlane.xlu0 %1052  ;;  %v614_v52 = vlaneseq }
 0x20d   : > { %v1059_v10 = vpop.xlane.xlu1 %1058 }
 0x20e   : > { %592 = vadd.xlane.f32.xlu1 %v579_v11  ;;  %590 = vadd.xlane.f32.xlu0 %v578_v12  ;;  %v1057_v56 = vpop.xlane.xlu0 %1056 }
 0x20f   : > { %v1070_v32 = vmax.f32 %v1057_v56, 1e-24 }
 0x211   : > { %v1818_v16 = vpop.xlane.xlu1 %1062  ;;  %1312 = vrsqrt.f32 %v1070_v32 }
 0x212   : > { %650 = vadd.xlane.f32.xlu1 %v637_v3  ;;  %648 = vadd.xlane.f32.xlu0 %v636_v33  ;;  %v1820_v1 = vpop.xlane.xlu0 %1060  ;;  %v1831_v3 = vand.u32 127, %v614_v52 }
 0x214   : > { %vm696_vm1 = vcmp.eq.s32.totalorder %v1831_v3, 0  ;;  %vm793_vm2 = vcmp.eq.s32.totalorder %v1831_v3, 1  ;;  %vm890_vm3 = vcmp.eq.s32.totalorder %v1831_v3, 2  ;;  %vm987_vm4 = vcmp.eq.s32.totalorder %v1831_v3, 3 }
 0x215   : > { %v1823_v49 = vpop.xlane.xlu1 %1066  ;;  %vm1084_vm5 = vcmp.eq.s32.totalorder %v1831_v3, 4 }
 0x216   : > { %747 = vadd.xlane.f32.xlu1 %v734_v34  ;;  %745 = vadd.xlane.f32.xlu0 %v733_v43  ;;  %v1825_v62 = vpop.xlane.xlu0 %1064  ;;  %v1303_v43 = vpop.eup %1302 }
 0x217   : > { %v1305_v54 = vpop.eup %1304 }
 0x21a   : > { %844 = vadd.xlane.f32.xlu1 %v831_v63  ;;  %842 = vadd.xlane.f32.xlu0 %v830_v31  ;;  %v1071_v63 = vmax.f32 %v1059_v10, 1e-24 }
 0x21e   : > { %941 = vadd.xlane.f32.xlu1 %v928_v37  ;;  %939 = vadd.xlane.f32.xlu0 %v927_v47  ;;  %v1307_v37 = vpop.eup %1306  ;;  %v680_v47 = vmax.f32 %v1705_v24, 1e-24 }
 0x222   : > { %1038 = vadd.xlane.f32.xlu1 %v1025_v48  ;;  %1036 = vadd.xlane.f32.xlu0 %v1024_v41  ;;  %v1309_v41 = vpop.eup %1308 }
 0x223   : > { %v1311_v56 = vpop.eup %1310 }
 0x224   : > { %v1313_v7 = vpop.eup %1312 }
 0x226   : > { %1042 = vadd.xlane.f32.xlu1 %v1027_v6  ;;  %1040 = vadd.xlane.f32.xlu0 %v1026_v27  ;;  %v777_v6 = vmax.f32 %v1738_v15, 1e-24 }
 0x257   : > { %v645_v14 = vpop.xlane.xlu0 %644  ;;  %v587_v51 = vpop.xlane.xlu1 %586 }
 0x258   : > { %v600_v12 = vmax.f32 %v587_v51, 1e-24  ;;  %v699_v48 = vmul.f32 %v1303_v43, %v645_v14  ;;  %v778_v51 = vmax.f32 %v1736_v2, 1e-24  ;;  %v875_v43 = vmax.f32 %v1774_v21, 1e-24 }
 0x25a   : > { %1314 = vrsqrt.f32 %v600_v12  ;;  %v707_v15 = vsel %vm696_vm1, %v699_v48, 0.0 }
 0x25b   : > { %v742_v17 = vpop.xlane.xlu0 %741  ;;  %v589_v11 = vpop.xlane.xlu1 %588  ;;  %1316 = vrsqrt.f32 %v877_v23 }
 0x25c   : > { %1318 = vrsqrt.f32 %v974_v22  ;;  %v796_v27 = vmul.f32 %v1307_v37, %v742_v17  ;;  %v601_v10 = vmax.f32 %v589_v11, 1e-24  ;;  %v874_v17 = vmax.f32 %v1776_v59, 1e-24 }
 0x25d   : > { %1320 = vrsqrt.f32 %v1071_v63  ;;  %v971_v63 = vmax.f32 %v1804_v40, 1e-24 }
 0x25e   : > { %1322 = vrsqrt.f32 %v680_v47  ;;  %v804_v36 = vsel %vm793_vm2, %v796_v27, %v707_v15  ;;  %v1068_v27 = vmax.f32 %v1816_v57, 1e-24 }
 0x25f   : > { %v839_v33 = vpop.xlane.xlu0 %838  ;;  %v647_v34 = vpop.xlane.xlu1 %646  ;;  %1324 = vrsqrt.f32 %v601_v10 }
 0x260   : > { %v700_v31 = vmul.f32 %v1301_v4, %v647_v34  ;;  %v893_v45 = vmul.f32 %v1309_v41, %v839_v33  ;;  %1326 = vrsqrt.f32 %v777_v6  ;;  %v972_v41 = vmax.f32 %v1802_v28, 1e-24 }
 0x261   : > { %1328 = vrsqrt.f32 %v681_v26 }
 0x262   : > { %v708_v25 = vsel %vm696_vm1, %v700_v31, 0.0  ;;  %v901_v32 = vsel %vm890_vm3, %v893_v45, %v804_v36  ;;  %1330 = vrsqrt.f32 %v778_v51 }
 0x263   : > { %v936_v60 = vpop.xlane.xlu0 %935  ;;  %v744_v61 = vpop.xlane.xlu1 %743  ;;  %1332 = vrsqrt.f32 %v874_v17 }
 0x264   : > { %v797_v42 = vmul.f32 %v1305_v54, %v744_v61  ;;  %v990_v24 = vmul.f32 %v1311_v56, %v936_v60  ;;  %v1315_v12 = vpop.eup %1314  ;;  %1334 = vrsqrt.f32 %v875_v43 }
 0x265   : > { %v1317_v23 = vpop.eup %1316  ;;  %1336 = vrsqrt.f32 %v971_v63 }
 0x266   : > { %v805_v44 = vsel %vm793_vm2, %v797_v42, %v708_v25  ;;  %v998_v11 = vsel %vm987_vm4, %v990_v24, %v901_v32  ;;  %v1319_v34 = vpop.eup %1318  ;;  %1338 = vrsqrt.f32 %v972_v41 }
 0x267   : > { %v1033_v13 = vpop.xlane.xlu0 %1032  ;;  %v841_v14 = vpop.xlane.xlu1 %840  ;;  %1340 = vrsqrt.f32 %v1068_v27 }
 0x268   : > { %v1087_v52 = vmul.f32 %v1313_v7, %v1033_v13  ;;  %v894_v59 = vmul.f32 %v1317_v23, %v841_v14  ;;  %v1321_v31 = vpop.eup %1320 }
 0x269   : > { %v1323_v48 = vpop.eup %1322 }
 0x26a   : > { %v1095_v2 = vsel %vm1084_vm5, %v1087_v52, %v998_v11  ;;  %v902_v26 = vsel %vm890_vm3, %v894_v59, %v805_v44  ;;  %v1325_v61 = vpop.eup %1324 }
 0x26b   : > { %v1103_v22 = vmul.f32 %v1315_v12, %v1095_v2  ;;  %v938_v4 = vpop.xlane.xlu1 %937  ;;  %v583_v33 = vpop.xlane.xlu0 %582 }
 0x26c   : > { %v991_v54 = vmul.f32 %v1319_v34, %v938_v4  ;;  %v1327_v56 = vpop.eup %1326  ;;  %v598_v25 = vmax.f32 %v583_v33, 1e-24  ;;  %v687_v4 = vmax.f32 %v1727_v50, 1e-24  ;;  %v1069_v34 = vmax.f32 %v1814_v9, 1e-24 }
 0x26d   : > { %1111 = vst [vmem:[%s1859_s14 + $0x10] sm:$0xff] %v1103_v22  ;;  %v1329_v42 = vpop.eup %1328  ;;  %v783_v50 = vmax.f32 %v1772_v20, 1e-24  ;;  %v880_v20 = vmax.f32 %v1796_v5, 1e-24 }
 0x26e   : > { %v999_v21 = vsel %vm987_vm4, %v991_v54, %v902_v26  ;;  %v1331_v44 = vpop.eup %1330  ;;  %1342 = vrsqrt.f32 %v598_v25  ;;  %v686_v54 = vmax.f32 %v1729_v55, 1e-24 }
 0x26f   : > { %v1035_v37 = vpop.xlane.xlu1 %1034  ;;  %v641_v47 = vpop.xlane.xlu0 %640  ;;  %1344 = vrsqrt.f32 %v687_v4 }
 0x270   : > { %v1088_v6 = vmul.f32 %v1321_v31, %v1035_v37  ;;  %v697_v60 = vmul.f32 %v1323_v48, %v641_v47  ;;  %v1333_v36 = vpop.eup %1332  ;;  %v784_v48 = vmax.f32 %v1770_v0, 1e-24  ;;  %1346 = vrsqrt.f32 %v1069_v34 }
 0x271   : > { %v1335_v12 = vpop.eup %1334  ;;  %1348 = vrsqrt.f32 %v686_v54 }
 0x272   : > { %v1096_v40 = vsel %vm1084_vm5, %v1088_v6, %v999_v21  ;;  %v705_v57 = vsel %vm696_vm1, %v697_v60, 0.0  ;;  %v1337_v22 = vpop.eup %1336  ;;  %1350 = vrsqrt.f32 %v784_v48 }
 0x273   : > { %v1104_v10 = vmul.f32 %v1325_v61, %v1096_v40  ;;  %v643_v28 = vpop.xlane.xlu1 %642  ;;  %v738_v45 = vpop.xlane.xlu0 %737  ;;  %v881_v61 = vmax.f32 %v1794_v18, 1e-24  ;;  %1352 = vrsqrt.f32 %v783_v50 }
 0x274   : > { %v794_v24 = vmul.f32 %v1327_v56, %v738_v45  ;;  %v698_v15 = vmul.f32 %v1329_v42, %v643_v28  ;;  %v1339_v43 = vpop.eup %1338  ;;  %v978_v28 = vmax.f32 %v1810_v39, 1e-24  ;;  %v977_v45 = vmax.f32 %v1812_v58, 1e-24 }
 0x275   : > { %1112 = vst [vmem:[%s1859_s14 + $0x18] sm:$0xff] %v1104_v10  ;;  %v1341_v31 = vpop.eup %1340 }
 0x276   : > { %v802_v7 = vsel %vm793_vm2, %v794_v24, %v705_v57  ;;  %v706_v52 = vsel %vm696_vm1, %v698_v15, 0.0 }
 0x277   : > { %v740_v13 = vpop.xlane.xlu1 %739  ;;  %v835_v14 = vpop.xlane.xlu0 %834 }
 0x278   : > { %v795_v51 = vmul.f32 %v1331_v44, %v740_v13  ;;  %v891_v32 = vmul.f32 %v1333_v36, %v835_v14  ;;  %v1343_v6 = vpop.eup %1342 }
 0x279   : > { %v1345_v42 = vpop.eup %1344 }
 0x27a   : > { %v803_v17 = vsel %vm793_vm2, %v795_v51, %v706_v52  ;;  %v899_v11 = vsel %vm890_vm3, %v891_v32, %v802_v7  ;;  %v1347_v25 = vpop.eup %1346  ;;  %v685_v52 = vmax.f32 %v1717_v53, 1e-24 }
 0x27b   : > { %v837_v2 = vpop.xlane.xlu1 %836  ;;  %v932_v23 = vpop.xlane.xlu0 %931 }
 0x27c   : > { %v892_v33 = vmul.f32 %v1335_v12, %v837_v2  ;;  %v988_v59 = vmul.f32 %v1337_v22, %v932_v23  ;;  %v1349_v57 = vpop.eup %1348  ;;  %v684_v23 = vmax.f32 %v1719_v19, 1e-24 }
 0x27d   : > { %v1351_v7 = vpop.eup %1350 }
 0x27e   : > { %v900_v63 = vsel %vm890_vm3, %v892_v33, %v803_v17  ;;  %v996_v9 = vsel %vm987_vm4, %v988_v59, %v899_v11  ;;  %v1353_v36 = vpop.eup %1352  ;;  %v782_v59 = vmax.f32 %v1756_v8, 1e-24 }
 0x27f   : > { %v934_v37 = vpop.xlane.xlu1 %933  ;;  %v1029_v47 = vpop.xlane.xlu0 %1028 }
 0x280   : > { %v989_v41 = vmul.f32 %v1339_v43, %v934_v37  ;;  %v1085_v26 = vmul.f32 %v1341_v31, %v1029_v47 }
 0x282   : > { %v997_v55 = vsel %vm987_vm4, %v989_v41, %v900_v63  ;;  %v1093_v27 = vsel %vm1084_vm5, %v1085_v26, %v996_v9  ;;  %v781_v63 = vmax.f32 %v1758_v35, 1e-24  ;;  %v879_v26 = vmax.f32 %v1786_v29, 1e-24 }
 0x283   : > { %v1101_v21 = vmul.f32 %v1343_v6, %v1093_v27  ;;  %v1031_v60 = vpop.xlane.xlu1 %1030  ;;  %v585_v0 = vpop.xlane.xlu0 %584  ;;  %v878_v9 = vmax.f32 %v1788_v30, 1e-24  ;;  %v975_v29 = vmax.f32 %v1808_v46, 1e-24 }
 0x284   : > { %v599_v40 = vmax.f32 %v585_v0, 1e-24  ;;  %v1086_v15 = vmul.f32 %v1347_v25, %v1031_v60  ;;  %v1075_v25 = vmax.f32 %v1823_v49, 1e-24 }
 0x285   : > { %1109 = vst [vmem:[%s1859_s14] sm:$0xff] %v1101_v21  ;;  %v976_v21 = vmax.f32 %v1806_v38, 1e-24 }
 0x286   : > { %1354 = vrsqrt.f32 %v599_v40  ;;  %v1094_v39 = vsel %vm1084_vm5, %v1086_v15, %v997_v55  ;;  %v1073_v40 = vmax.f32 %v1818_v16, 1e-24 }
 0x287   : > { %v1901_v56 = vpop.xlane.xlu1 %596  ;;  %v1903_v10 = vpop.xlane.xlu0 %594  ;;  %1356 = vrsqrt.f32 %v881_v61 }
 0x288   : > { %1358 = vrsqrt.f32 %v880_v20  ;;  %v1072_v20 = vmax.f32 %v1820_v1, 1e-24 }
 0x289   : > { %1360 = vrsqrt.f32 %v978_v28 }
 0x28a   : > { %1362 = vrsqrt.f32 %v977_v45 }
 0x28b   : > { %v655_v24 = vpop.xlane.xlu1 %654  ;;  %v653_v18 = vpop.xlane.xlu0 %652  ;;  %1364 = vrsqrt.f32 %v685_v52 }
 0x28c   : > { %v704_v5 = vmul.f32 %v1345_v42, %v655_v24  ;;  %v703_v44 = vmul.f32 %v1349_v57, %v653_v18  ;;  %1366 = vrsqrt.f32 %v684_v23 }
 0x28d   : > { %1368 = vrsqrt.f32 %v782_v59 }
 0x28e   : > { %v712_v11 = vsel %vm696_vm1, %v704_v5, 0.0  ;;  %v711_v12 = vsel %vm696_vm1, %v703_v44, 0.0  ;;  %1370 = vrsqrt.f32 %v781_v63  ;;  %v1074_v44 = vmax.f32 %v1825_v62, 1e-24 }
 0x28f   : > { %v752_v13 = vpop.xlane.xlu1 %751  ;;  %v750_v14 = vpop.xlane.xlu0 %749  ;;  %1372 = vrsqrt.f32 %v879_v26 }
 0x290   : > { %v1355_v51 = vpop.eup %1354  ;;  %v801_v58 = vmul.f32 %v1351_v7, %v752_v13  ;;  %v800_v32 = vmul.f32 %v1353_v36, %v750_v14  ;;  %1374 = vrsqrt.f32 %v878_v9  ;;  %v605_v14 = vmax.f32 %v1901_v56, 1e-24 }
 0x291   : > { %v1102_v17 = vmul.f32 %v1355_v51, %v1094_v39  ;;  %v1357_v2 = vpop.eup %1356  ;;  %1376 = vrsqrt.f32 %v976_v21  ;;  %v604_v39 = vmax.f32 %v1903_v10, 1e-24 }
 0x292   : > { %v809_v22 = vsel %vm793_vm2, %v801_v58, %v712_v11  ;;  %v808_v4 = vsel %vm793_vm2, %v800_v32, %v711_v12  ;;  %v1359_v33 = vpop.eup %1358  ;;  %1378 = vrsqrt.f32 %v975_v29 }
 0x293   : > { %1110 = vst [vmem:[%s1859_s14 + $0x8] sm:$0xff] %v1102_v17  ;;  %v849_v34 = vpop.xlane.xlu1 %848  ;;  %v847_v53 = vpop.xlane.xlu0 %846  ;;  %1380 = vrsqrt.f32 %v1073_v40 }
 0x294   : > { %v898_v43 = vmul.f32 %v1357_v2, %v849_v34  ;;  %v897_v54 = vmul.f32 %v1359_v33, %v847_v53  ;;  %v1361_v31 = vpop.eup %1360  ;;  %1382 = vrsqrt.f32 %v1072_v20 }
 0x295   : > { %v1363_v47 = vpop.eup %1362  ;;  %1384 = vrsqrt.f32 %v1075_v25 }
 0x296   : > { %v906_v19 = vsel %vm890_vm3, %v898_v43, %v809_v22  ;;  %v905_v37 = vsel %vm890_vm3, %v897_v54, %v808_v4  ;;  %v1365_v60 = vpop.eup %1364 }
 0x297   : > { %v946_v48 = vpop.xlane.xlu1 %945  ;;  %v944_v41 = vpop.xlane.xlu0 %943 }
 0x298   : > { %v995_v8 = vmul.f32 %v1361_v31, %v946_v48  ;;  %v994_v50 = vmul.f32 %v1363_v47, %v944_v41  ;;  %v1367_v30 = vpop.eup %1366 }
 0x299   : > { %v1369_v42 = vpop.eup %1368 }
 0x29a   : > { %v1930_v35 = vsel %vm987_vm4, %v995_v8, %v906_v19  ;;  %v1934_v6 = vsel %vm987_vm4, %v994_v50, %v905_v37  ;;  %v1371_v24 = vpop.eup %1370 }
 0x29b   : > { %v593_v55 = vpop.xlane.xlu1 %592  ;;  %v591_v27 = vpop.xlane.xlu0 %590 }
 0x29c   : > { %v603_v38 = vmax.f32 %v593_v55, 1e-24  ;;  %v602_v46 = vmax.f32 %v591_v27, 1e-24  ;;  %v1373_v7 = vpop.eup %1372 }
 0x29d   : > { %v1375_v13 = vpop.eup %1374 }
 0x29e   : > { %1386 = vrsqrt.f32 %v603_v38  ;;  %v1377_v52 = vpop.eup %1376 }
 0x29f   : > { %v651_v0 = vpop.xlane.xlu1 %650  ;;  %v649_v61 = vpop.xlane.xlu0 %648  ;;  %1388 = vrsqrt.f32 %v602_v46 }
 0x2a0   : > { %v702_v28 = vmul.f32 %v1365_v60, %v651_v0  ;;  %v701_v45 = vmul.f32 %v1367_v30, %v649_v61  ;;  %1390 = vrsqrt.f32 %v1074_v44  ;;  %v1379_v12 = vpop.eup %1378 }
 0x2a1   : > { %1392 = vrsqrt.f32 %v605_v14  ;;  %v1381_v4 = vpop.eup %1380 }
 0x2a2   : > { %v710_v16 = vsel %vm696_vm1, %v702_v28, 0.0  ;;  %v709_v1 = vsel %vm696_vm1, %v701_v45, 0.0  ;;  %1394 = vrsqrt.f32 %v604_v39  ;;  %v1383_v34 = vpop.eup %1382 }
 0x2a3   : > { %v748_v18 = vpop.xlane.xlu1 %747  ;;  %v746_v57 = vpop.xlane.xlu0 %745 }
 0x2a4   : > { %v799_v15 = vmul.f32 %v1369_v42, %v748_v18  ;;  %v798_v5 = vmul.f32 %v1371_v24, %v746_v57  ;;  %v1385_v43 = vpop.eup %1384 }
 0x2a6   : > { %v807_v49 = vsel %vm793_vm2, %v799_v15, %v710_v16  ;;  %v806_v36 = vsel %vm793_vm2, %v798_v5, %v709_v1 }
 0x2a7   : > { %v845_v51 = vpop.xlane.xlu1 %844  ;;  %v843_v62 = vpop.xlane.xlu0 %842 }
 0x2a8   : > { %v896_v58 = vmul.f32 %v1373_v7, %v845_v51  ;;  %v895_v32 = vmul.f32 %v1375_v13, %v843_v62  ;;  %v1387_v31 = vpop.eup %1386 }
 0x2a9   : > { %v1389_v19 = vpop.eup %1388 }
 0x2aa   : > { %v904_v17 = vsel %vm890_vm3, %v896_v58, %v807_v49  ;;  %v903_v11 = vsel %vm890_vm3, %v895_v32, %v806_v36  ;;  %v1391_v48 = vpop.eup %1390 }
 0x2ab   : > { %v942_v2 = vpop.xlane.xlu1 %941  ;;  %v940_v56 = vpop.xlane.xlu0 %939 }
 0x2ac   : > { %v993_v23 = vmul.f32 %v1377_v52, %v942_v2  ;;  %v992_v22 = vmul.f32 %v1379_v12, %v940_v56  ;;  %v1393_v27 = vpop.eup %1392 }
 0x2ad   : > { %v1395_v21 = vpop.eup %1394 }
 0x2ae   : > { %v1001_v10 = vsel %vm987_vm4, %v993_v23, %v904_v17  ;;  %v1000_v33 = vsel %vm987_vm4, %v992_v22, %v903_v11 }
 0x2af   : > { %v1039_v53 = vpop.xlane.xlu1 %1038  ;;  %v1037_v59 = vpop.xlane.xlu0 %1036 }
 0x2b0   : > { %v1090_v54 = vmul.f32 %v1381_v4, %v1039_v53  ;;  %v1089_v63 = vmul.f32 %v1383_v34, %v1037_v59 }
 0x2b2   : > { %v1098_v37 = vsel %vm1084_vm5, %v1090_v54, %v1001_v10  ;;  %v1097_v47 = vsel %vm1084_vm5, %v1089_v63, %v1000_v33 }
 0x2b3   : > { %v1106_v41 = vmul.f32 %v1387_v31, %v1098_v37  ;;  %v1105_v26 = vmul.f32 %v1389_v19, %v1097_v47  ;;  %v1043_v8 = vpop.xlane.xlu1 %1042  ;;  %v1041_v50 = vpop.xlane.xlu0 %1040 }
 0x2b4   : > { %v1092_v9 = vmul.f32 %v1385_v43, %v1043_v8  ;;  %v1091_v55 = vmul.f32 %v1391_v48, %v1041_v50 }
 0x2b5   : > { %1114 = vst [vmem:[%s1859_s14 + $0x28] sm:$0xff] %v1106_v41  ;;  %1113 = vst [vmem:[%s1859_s14 + $0x20] sm:$0xff] %v1105_v26 }
 0x2b6   : > { %v1100_v29 = vsel %vm1084_vm5, %v1092_v9, %v1930_v35  ;;  %v1099_v60 = vsel %vm1084_vm5, %v1091_v55, %v1934_v6 }
 0x2b7   : > { %v1108_v0 = vmul.f32 %v1393_v27, %v1100_v29  ;;  %v1107_v61 = vmul.f32 %v1395_v21, %v1099_v60 }
 0x2b9   : > { %1116 = vst [vmem:[%s1859_s14 + $0x38] sm:$0xff] %v1108_v0  ;;  %1115 = vst [vmem:[%s1859_s14 + $0x30] sm:$0xff] %v1107_v61 }
 0x2ba PF: > { %s16_s21 = sadd.s32 1, %s1402_s21  }
 0x2bb   : > { %p13_p4 = scmp.ge.s32.totalorder %s16_s21, 6  }
 0x2bd   :  { %15 = sbr.rel (!%p13_p4) target bundleno = 1 (0x1), region = 77 }

</bundles_post_ra>
